<compile_context>
chip_gen: v6e
topology: v6e:2x2x1
jax: 0.10.0
libtpu: 0.0.40
codegen_flags: <defaults>
</compile_context>

<pallas_src>
import jax
import jax.numpy as jnp
from jax.experimental import pallas as pl
from jax.experimental.pallas import tpu as pltpu

_EPS = 1e-12                      # matches torch.nn.functional.normalize default
_LANE = 128
_TARGET_BLOCK_BYTES = 4 * 1024 * 1024   # ~4 MiB per-array block (safe on v5e/v6e/v7x)


def _sublane_pack(dtype):
    """Sublane packing: 8 for f32, 16 for bf16, 32 for int8/fp8."""
    return max(8, 32 // jnp.dtype(dtype).itemsize)


def _l2norm_kernel(x_ref, o_ref):
    # x_ref, o_ref: (tile_rows, D_pad) VMEM tiles.
    x = x_ref[...]
    xf = x.astype(jnp.float32)
    sumsq = jnp.sum(xf * xf, axis=-1, keepdims=True)
    # v / max(||v||, eps) == v * rsqrt(max(||v||^2, eps^2)) since sqrt is monotone.
    # rsqrt runs on the EUP (otherwise idle here) instead of a VALU-wide divide.
    # NOTE: sum(x*x) can overflow f32 for |x| ~ 1.8e19 — same as torch F.normalize.
    inv = jax.lax.rsqrt(jnp.maximum(sumsq, jnp.float32(_EPS * _EPS)))
    # Scale in the input dtype (avoids a live full-size f32 copy for bf16 inputs).
    o_ref[...] = (x * inv.astype(x.dtype)).astype(o_ref.dtype)


def l2norm(t, dim=-1):
    """Pallas equivalent of F.normalize(t, dim=dim, p=2)."""
    ndim = t.ndim
    if ndim == 0:
        return l2norm(t.reshape(1, 1), dim=-1).reshape(())

    axis = dim % ndim
    if axis != ndim - 1:
        # Move the normalization axis to the end, normalize, move back (JAX glue).
        perm = [i for i in range(ndim) if i != axis] + [axis]
        inv_perm = [perm.index(i) for i in range(ndim)]
        return jnp.transpose(l2norm(jnp.transpose(t, perm), dim=-1), inv_perm)

    orig_shape = t.shape
    D = orig_shape[-1]
    N = 1
    for s in orig_shape[:-1]:
        N *= s
    if N == 0 or D == 0:
        return t

    dtype = t.dtype
    itemsize = jnp.dtype(dtype).itemsize
    pack = _sublane_pack(dtype)

    x2d = t.reshape(N, D)

    # --- lane-dense feature dim: zero-pad D to a multiple of 128 (zeros do not
    # change the L2 norm); avoids masked vst.msk partial stores. ---
    D_pad = ((D + _LANE - 1) // _LANE) * _LANE
    if D_pad != D:
        x2d = jnp.pad(x2d, ((0, 0), (0, D_pad - D)))

    # --- byte-targeted row tile, rounded to the sublane packing ---
    row_bytes = D_pad * itemsize
    tile = max(pack, (_TARGET_BLOCK_BYTES // row_bytes) // pack * pack)
    n_ceil = ((N + pack - 1) // pack) * pack
    tile = min(tile, n_ceil)
    if pl.cdiv(N, tile) == 1 and n_ceil >= 2 * pack:
        # v7x has 2 TensorCores per chip: give the parallel grid >= 2 steps.
        tile = ((n_ceil // 2 + pack - 1) // pack) * pack

    # --- zero-pad rows to a multiple of the tile (padded rows normalize to 0,
    # no NaN thanks to the eps^2 clamp); no divisibility assert needed. ---
    N_pad = pl.cdiv(N, tile) * tile
    if N_pad != N:
        x2d = jnp.pad(x2d, ((0, N_pad - N), (0, 0)))

    grid = (N_pad // tile,)

    # --- scoped VMEM: in + out double-buffered + f32 working copy + headroom ---
    block_bytes = tile * D_pad * itemsize
    vmem_needed = 2 * 2 * block_bytes + tile * D_pad * 4 + (2 << 20)
    vmem_limit = int(min(max(vmem_needed, 32 << 20), 64 << 20))  # stay under v7x physical

    cost = pl.CostEstimate(
        flops=3 * N * D,
        transcendentals=N,
        bytes_accessed=2 * N * D * itemsize,
    )

    out2d = pl.pallas_call(
        _l2norm_kernel,
        out_shape=jax.ShapeDtypeStruct((N_pad, D_pad), dtype),
        grid_spec=pltpu.PrefetchScalarGridSpec(
            num_scalar_prefetch=0,
            grid=grid,
            in_specs=[pl.BlockSpec((tile, D_pad), lambda i: (i, 0))],
            out_specs=pl.BlockSpec((tile, D_pad), lambda i: (i, 0)),
        ),
        compiler_params=pltpu.CompilerParams(
            dimension_semantics=("parallel",),
            vmem_limit_bytes=vmem_limit,
        ),
        cost_estimate=cost,
    )(x2d)

    if N_pad != N or D_pad != D:
        out2d = out2d[:N, :D]
    return out2d.reshape(orig_shape)


class L2Norm:
    """Mirror of the PyTorch L2Norm module (no parameters)."""

    def __init__(self, dim=-1):
        self.dim = dim

    def __call__(self, t):
        return l2norm(t, dim=self.dim)


if __name__ == "__main__":
    def ref_l2norm(x, axis=-1):
        xf = x.astype(jnp.float32)
        n = jnp.sqrt(jnp.sum(xf * xf, axis=axis, keepdims=True))
        return xf / jnp.maximum(n, _EPS)

    mod = L2Norm(dim=-1)

    # (batch, seq, hidden) f32 — exercises D padding (32 -> 128) and a 2-step grid.
    x = jax.random.normal(jax.random.PRNGKey(0), (2, 8, 32), dtype=jnp.float32)
    out = jax.block_until_ready(mod(x))
    assert out.shape == x.shape
    assert jnp.max(jnp.abs(out - ref_l2norm(x))) < 1e-5

    # Odd row count (not a multiple of the tile) + non-128 feature dim.
    x2 = jax.random.normal(jax.random.PRNGKey(1), (3, 5, 40), dtype=jnp.float32)
    out2 = jax.block_until_ready(l2norm(x2, dim=-1))
    assert jnp.max(jnp.abs(out2 - ref_l2norm(x2))) < 1e-5

    # Normalization along a non-last axis (handled via transpose glue).
    x3 = jax.random.normal(jax.random.PRNGKey(2), (2, 4, 16, 16), dtype=jnp.float32)
    out3 = jax.block_until_ready(l2norm(x3, dim=1))
    assert jnp.max(jnp.abs(out3 - ref_l2norm(x3, axis=1))) < 1e-5

    # bf16 I/O path (mem-bound win on v5e); looser tolerance vs f32 reference.
    x4 = jax.random.normal(jax.random.PRNGKey(3), (4, 16, 256), dtype=jnp.bfloat16)
    out4 = jax.block_until_ready(l2norm(x4, dim=-1))
    err = jnp.max(jnp.abs(out4.astype(jnp.float32) - ref_l2norm(x4)))
    assert err < 2e-2

    print("KERNEL_OK")
</pallas_src>

<mosaic_0001>
module attributes {stable_mosaic.version = 11 : i64} {
  func.func @_l2norm_kernel(%arg0: i32, %arg1: memref<8x128xf32, #tpu.memory_space<vmem>>, %arg2: memref<8x128xf32, #tpu.memory_space<vmem>>) attributes {dimension_semantics = [#tpu.dimension_semantics<parallel>], iteration_bounds = array<i64: 2>, scalar_prefetch = 0 : i64, scratch_operands = 0 : i64, tpu.core_type = #tpu.core_type<tc>, window_params = [{transform_indices = @transform_0, window_bounds = array<i64: 8, 128>}, {transform_indices = @transform_1, window_bounds = array<i64: 8, 128>}]} {
    %c0 = arith.constant 0 : index
    %c0_0 = arith.constant 0 : index
    %0 = vector.load %arg1[%c0, %c0_0] : memref<8x128xf32, #tpu.memory_space<vmem>>, vector<8x128xf32>
    %1 = arith.mulf %0, %0 : vector<8x128xf32>
    %cst = arith.constant dense<0.000000e+00> : vector<8xf32>
    %2 = vector.multi_reduction <add>, %1, %cst [1] : vector<8x128xf32> to vector<8xf32>
    %3 = vector.shape_cast %2 : vector<8xf32> to vector<8x1xf32>
    %cst_1 = arith.constant 1.000000e-24 : f32
    %4 = vector.broadcast %cst_1 : f32 to vector<8x1xf32>
    %5 = arith.maximumf %3, %4 : vector<8x1xf32>
    %6 = math.rsqrt %5 : vector<8x1xf32>
    %7 = vector.broadcast %6 : vector<8x1xf32> to vector<8x128xf32>
    %8 = arith.mulf %0, %7 : vector<8x128xf32>
    %c0_2 = arith.constant 0 : index
    %c0_3 = arith.constant 0 : index
    %9 = vector.load %arg2[%c0_2, %c0_3] : memref<8x128xf32, #tpu.memory_space<vmem>>, vector<8x128xf32>
    tpu.vector_store %arg2[%c0_2, %c0_3], %8 {strides = array<i32>} : memref<8x128xf32, #tpu.memory_space<vmem>>, vector<8x128xf32>,
    return
  }
  func.func @transform_0(%arg0: i32) -> (i32, i32) {
    %c0_i32 = arith.constant 0 : i32
    %c0_i32_0 = arith.constant 0 : i32
    return %arg0, %c0_i32 : i32, i32
  }
  func.func @transform_1(%arg0: i32) -> (i32, i32) {
    %c0_i32 = arith.constant 0 : i32
    %c0_i32_0 = arith.constant 0 : i32
    return %arg0, %c0_i32 : i32, i32
  }
}

</mosaic_0001>

<bundles_post_ra>
// kernel: tpu_custom_call.1
= control target key start
LH: loop header
LB: loop body
LE: loop exit
PB: predicated region body
PF: predicated region fallthrough
CT: control target
= control target key end

     0   :  { %6 = vsyncpa [#allocation3], 0  ;;  %s531_s0 = inlined_call_operand.hbm [shape: f32[16,128], index: 0, kind: input, shape index: {}]   ;;  %s532_s1 = inlined_call_operand.hbm [shape: f32[16,128], index: 1, kind: output, shape index: {}]  }
   0x1   :  { %8 = vsyncpa [#allocation3 + $0x1], 0 }
   0x2   :  { %9 = vsyncpa [#allocation4], 0 }
   0x3   :  { %11 = vsyncpa [#allocation4 + $0x1], 0  ;;  %s390_s6 = smov 0   ;;  %s392_s7 = smov 0  }
   0x4   :  { %s394_s8 = smov 0   ;;  %s396_s9 = smov 0  }
   0x5 LB: > { %s411_s10 = sadd.s32 4294967295, %s376_s9   ;;  %s224_s11 = sadd.s32 4294967294, %s376_s9   ;;  %s376_s9 = sphi %s396_s9, %s549_s9   ;;  %s372_s8 = sphi %s394_s8, %s548_s8   ;;  %s368_s7 = sphi %s392_s7, %s547_s7   ;;  %s364_s6 = sphi %s390_s6, %s546_s6  }
   0x6   : > { %s415_s12 = sadd.s32 1, %s376_s9   ;;  %s24_s13 = sadd.s32 1, %s372_s8 }
   0x7   : > { %s21_s14 = ssub.s32 %s376_s9, %s415_s12  ;;  %p31_p0 = scmp.ne.s32.totalorder %s372_s8, %s368_s7 }
   0x8   : > { %p22_p1 = scmp.eq.s32.totalorder %s21_s14, 0  ;;  %p32_p2 = scmp.eq.s32.totalorder %s376_s9, 0 }
   0x9   : > { %p37_p3 = scmp.ne.s32.totalorder %s368_s7, %s364_s6  ;;  %p38_p4 = scmp.eq.s32.totalorder %s411_s10, 0 }
   0xa   : > { %s427_s15 = scalar_select %p22_p1, %s372_s8, %s24_s13  }
   0xb   : > { %p429_p5 = por %p32_p2, %p31_p0  ;;  %p433_p6 = por %p38_p4, %p37_p3 }
   0xc   : > { %p61_p7 = scmp.eq.s32.totalorder %s411_s10, 1  ;;  %p67_p8 = scmp.eq.s32.totalorder %s224_s11, 1 }
   0xd   : > { %s536_s17 = scalar_select %p433_p6, 1, 0 }
   0xe   : > { %p248_p10 = scmp.lt.s32.totalorder %s376_s9, 2  ;;  %p440_p11 = por %p61_p7, %p31_p0 }
   0xf   : > { %p444_p12 = por %p67_p8, %p37_p3  ;;  %s87_s20 = sand.u32 1, %s372_s8  }
  0x10   : > { %s537_s18 = scalar_select %p440_p11, 1, 0 }
  0x11   : > { %s538_s19 = scalar_select %p444_p12, 1, 0 }
  0x12   : > { %s228_s21 = sshll.u32 %s376_s9, 7  ;;  %s227_s22 = sshll.u32 %s87_s20, 3 }
  0x13   : > { %s453_s25 = scalar_lea.hbm %s531_s0, %s228_s21  ;;  %s91_s26 = scalar_lea.vmem [#allocation2], %s227_s22 }
  0x14   : > { %s98_s27 = sshll.u32 %s91_s26, 4  ;;  %p457_p13 = pnand %p248_p10, %p429_p5  ;;  %s461_s27 = int_to_ptr.vmem [resolvable:$true] %s98_s27 }
  0x15   : > { %s88_s29 = scalar_lea.sflag [#allocation3], %s87_s20  ;;  %s284_s30 = scalar_lea.hbm %s453_s25, 128 }
  0x16   : > { %p285_p2 = scmp.ne.s32.totalorder %s453_s25, %s284_s30  ;;  %p286_p3 = pneg %p457_p13 }
  0x17   : > { %s289_s4 = scalar_lea.hbm %s531_s0, 256  ;;  %p290_p5 = scmp.lt.s32.totalorder %s453_s25, %s531_s0 }
  0x18   : > { %p287_p4 = pnand %p286_p3, %p285_p2  ;;  %p291_p8 = scmp.lt.s32.totalorder %s289_s4, %s284_s30 }
  0x1a   : > { %p288_p7 = pneg %p287_p4  ;;  %p292_p10 = por %p291_p8, %p290_p5 }
  0x1c   : > { %p293_p9 = pnand %p292_p10, %p288_p7 }
  0x1e   : > { %296 = shalt.err (!%p293_p9)
}
  0x1f   : > { %s297_s13 = scalar_lea.vmem %s461_s27, 128  ;;  %s378_s14 = smov [#allocation2]  }
  0x20   : > { %p298_p0 = scmp.ne.s32.totalorder %s461_s27, %s297_s13  ;;  %s302_s16 = sshll.u32 %s378_s14, 4  ;;  %s303_s16 = int_to_ptr.vmem [resolvable:$false] %s302_s16 }
  0x21   : > { %s304_s20 = scalar_lea.vmem %s303_s16, 256  ;;  %p305_p4 = scmp.lt.s32.totalorder %s461_s27, %s303_s16 }
  0x22   : > { %p300_p1 = pnand %p298_p0, %p286_p3  ;;  %p306_p12 = scmp.lt.s32.totalorder %s304_s20, %s297_s13 }
  0x24   : > { %p301_p2 = pneg %p300_p1  ;;  %p307_p11 = por %p306_p12, %p305_p4 }
  0x26   : > { %p308_p6 = pnand %p307_p11, %p301_p2 }
  0x28   : > { %311 = shalt.err (!%p308_p6)
}
  0x29   : > { %243 = dma.hbm_to_vmem [thread:$0]  (!%p457_p13), %s453_s25, 128, %s461_s27, %s88_s29  }
  0x2a   : > { %p540_p9 = scmp.lt.s32.totalorder %s376_s9, 3  ;;  %p541_p7 = scmp.ge.s32.totalorder %s376_s9, 1 }
  0x2c   : > { %p104_p0 = pnand %p541_p7, %p540_p9 }
  0x2d   : > { %s488_s21 = sand.u32 (!%p104_p0), 1, %s368_s7   ;;  %p542_p6 = scmp.ne.s32.totalorder (!%p104_p0), %s536_s17, 0 }
  0x2e   : > { %107 = sbr.rel (%p104_p0) target bundleno = 224 (0xe0), region = 24  ;;  %s230_s22 = sshll.u32 (!%p104_p0), %s488_s21, 3 }
  0x2f   : > { %s110_s23 = scalar_lea.sflag (!%p104_p0), [#allocation3], %s488_s21  ;;  %s113_s24 = scalar_lea.vmem (!%p104_p0), [#allocation2], %s230_s22 }
  0x33   : > { %355 = dma.done.wait (%p542_p6), %s110_s23, 128  }
  0x34   : > { %357 = vsyncadd (%p542_p6), %s110_s23, 4294967168  ;;  %v132_v0 = vld [vmem:[%s113_s24] sm:$0xff]  ;;  %s233_s25 = sshll.u32 %s411_s10, 7  ;;  %s131_s26 = scalar_lea.vmem [#allocation5], %s230_s22 }
  0x35   : > { %v133_v1 = vmul.f32 %v132_v0, %v132_v0  ;;  %s154_s27 = sshll.u32 %s131_s26, 4  ;;  %s152_s30 = scalar_lea.hbm %s532_s1, %s233_s25  ;;  %s155_s27 = int_to_ptr.vmem [resolvable:$true] %s154_s27 }
  0x36   : > { %s141_s17 = scalar_lea.sflag [#allocation4], %s488_s21  ;;  %s312_s2 = scalar_lea.vmem %s155_s27, 128 }
  0x37   : > { %134 = vadd.xlane.f32.xlu0 %v133_v1  ;;  %p313_p11 = scmp.ne.s32.totalorder %s155_s27, %s312_s2  ;;  %p543_p12 = scmp.ne.s32.totalorder %s537_s18, 0 }
  0x38   : > { %s379_s3 = smov [#allocation5]  }
  0x39   : > { %p314_p13 = pnand %p313_p11, %p543_p12  ;;  %s316_s4 = sshll.u32 %s379_s3, 4  ;;  %s317_s4 = int_to_ptr.vmem [resolvable:$false] %s316_s4 }
  0x3a   : > { %s318_s10 = scalar_lea.vmem %s317_s4, 256  ;;  %p319_p3 = scmp.lt.s32.totalorder %s155_s27, %s317_s4 }
  0x3b   : > { %p315_p1 = pneg %p314_p13  ;;  %p320_p5 = scmp.lt.s32.totalorder %s318_s10, %s312_s2 }
  0x3d   : > { %p321_p8 = por %p320_p5, %p319_p3 }
  0x3f   : > { %p322_p10 = pnand %p321_p8, %p315_p1 }
  0xc0   : > { %v135_v2 = vpop.xlane.xlu0 %134 }
  0xc1   : > { %v136_v3 = vmax.f32 %v135_v2, 1e-24 }
  0xc3   : > { %282 = vrsqrt.f32 %v136_v3 }
  0xd0   : > { %v283_v4 = vpop.eup %282 }
  0xd1   : > { %v138_v5 = vmul.f32 %v283_v4, %v132_v0 }
  0xd3   : > { %139 = vst [vmem:[%s131_s26] sm:$0xff] %v138_v5 }
  0xd4   : > { %325 = shalt.err (!%p322_p10)
}
  0xd5   : > { %s326_s5 = scalar_lea.hbm %s152_s30, 128  ;;  %s330_s14 = scalar_lea.hbm %s532_s1, 256 }
  0xd6   : > { %p327_p2 = scmp.ne.s32.totalorder %s152_s30, %s326_s5  ;;  %p331_p7 = scmp.lt.s32.totalorder %s152_s30, %s532_s1 }
  0xd7   : > { %p332_p0 = scmp.lt.s32.totalorder %s330_s14, %s326_s5 }
  0xd8   : > { %p328_p4 = pnand %p327_p2, %p543_p12 }
  0xd9   : > { %p333_p6 = por %p332_p0, %p331_p7 }
  0xda   : > { %p329_p9 = pneg %p328_p4 }
  0xdc   : > { %p334_p11 = pnand %p333_p6, %p329_p9 }
  0xde   : > { %337 = shalt.err (!%p334_p11)
}
  0xdf   : > { %238 = dma.vmem_to_hbm [thread:$0]  (%p543_p12), %s155_s27, 128, %s152_s30, %s141_s17  }
  0xe0 PF: > { %s166_s21 = sand.u32 1, %s364_s6   ;;  %p544_p13 = scmp.ne.s32.totalorder %s538_s19, 0 }
  0xe1   : > { %p545_p1 = scmp.ge.s32.totalorder %s376_s9, 2  ;;  %s167_s22 = scalar_lea.sflag [#allocation4], %s166_s21 }
  0xe3   : > { %p245_p3 = pnand %p545_p1, %p544_p13 }
  0xe5   : > { %p246_p5 = pneg %p245_p3 }
  0xe7   : > { %359 = dma.done.wait (%p246_p5), %s167_s22, 128  }
  0xe8   : > { %361 = vsyncadd (%p246_p5), %s167_s22, 4294967168  ;;  %p14_p8 = scmp.ge.s32.totalorder %s415_s12, 4   ;;  %s546_s6 = smov %s368_s7 }
  0xe9   : > { %s547_s7 = smov %s372_s8  ;;  %s548_s8 = smov %s427_s15 }
  0xea   : > { %s549_s9 = smov %s415_s12  ;;  %16 = sbr.rel (!%p14_p8) target bundleno = 5 (0x5), region = 69 }
  0xef   :  { %172 = vsyncpa [#allocation3], 1 }
  0xf0   :  { %174 = vsyncpa [#allocation3 + $0x1], 1 }
  0xf1   :  { %175 = vsyncpa [#allocation4], 1 }
  0xf2   :  { %177 = vsyncpa [#allocation4 + $0x1], 1 }

</bundles_post_ra>
